<compile_context>
chip_gen: v6e
topology: v6e:2x2x1
jax: 0.10.0
libtpu: 0.0.40
codegen_flags: <defaults>
</compile_context>

<pallas_src>
import functools

import jax
import jax.numpy as jnp
from jax.experimental import pallas as pl
from jax.experimental.pallas import tpu as pltpu


def _point_diff_kernel(conv_ref, trans_ref, orig_ref, vec_ref,
                       wm_ref, wm1_ref, wg_ref, wd1_ref, wd2_ref, wi_ref,
                       out_ref, *, md, approx):
    f32 = jnp.float32

    # Packed per-channel vectors (C, 8):
    # [s_mlp | b_mlp | s_mlp1 | b_mlp1 | bias_gate | b_diff | pad | pad]
    vec = vec_ref[...]
    s_mlp, b_mlp = vec[:, 0:1], vec[:, 1:2]
    s_mlp1, b_mlp1 = vec[:, 2:3], vec[:, 3:4]
    bias_gate, b_diff = vec[:, 4:5], vec[:, 5:6]

    wm = wm_ref[...]
    wm1 = wm1_ref[...]
    wg = wg_ref[...]
    wd1 = wd1_ref[...]
    wd2 = wd2_ref[...]
    wi = wi_ref[...]                       # (N0, N) f32, exact lerp weights

    def sigmoid(x):
        return pl.reciprocal(1.0 + jnp.exp(-x), approx=approx)

    def mm(w, x):
        # 1x1 conv = channel-mixing matmul; operands optionally bf16,
        # accumulation always f32.
        return jnp.dot(w, x.astype(md), preferred_element_type=f32)

    nb = conv_ref.shape[0]                 # batches handled in this grid step
    for b in range(nb):                    # static unroll (nb is small)
        # mlp branch: BN affine + ReLU (f32, VPU) -> conv -> sigmoid.
        hc = jnp.maximum(conv_ref[b].astype(f32) * s_mlp + b_mlp, 0.0)
        conv = sigmoid(mm(wm, hc))
        # mlp1 branch.
        ht = jnp.maximum(trans_ref[b].astype(f32) * s_mlp1 + b_mlp1, 0.0)
        trans = sigmoid(mm(wm1, ht))
        # mlp_gate: s_gate folded into wg columns, b_gate -> additive bias.
        z = sigmoid(mm(wg, conv + trans) + bias_gate)

        # diff branch: Conv1d -> (folded BN) -> ReLU -> Conv1d, then the
        # linear interpolation as one small shared (N0, N) matmul (f32 exact).
        d = jnp.maximum(mm(wd1, orig_ref[b]) + b_diff, 0.0)
        d = mm(wd2, d)
        origin = jnp.dot(d, wi, preferred_element_type=f32)   # (C, N)

        # (1 - z) * conv + z * trans + origin == conv + z*(trans - conv) + origin
        out_ref[b] = (conv + z * (trans - conv) + origin).astype(out_ref.dtype)


def point_diff(conv_ly, trans_ly, origin_f, params, *, num_tiles=None,
               matmul_dtype=jnp.float32, approx_sigmoid=False,
               out_dtype=jnp.float32):
    """pointDiff forward. Inputs/outputs are PyTorch NCW: (B, C, N).

    num_tiles: number of grid steps (batch groups). Default B (one batch per
      step) -> shards across both v7x TensorCores for B >= 2 and keeps the
      per-step VMEM slab small. Use num_tiles < B to group batches when N is
      small and per-step overhead matters.
    matmul_dtype: bf16 halves matmul-operand bytes and is a win on v5e, v6e
      and v7x alike (the MXU is natively bf16); all elementwise math, the
      accumulation and the interpolation weights stay f32.
    approx_sigmoid: keep False (default); the approximate reciprocal buys
      nothing here and only loosens accuracy.
    out_dtype: bf16 halves output writeback bytes if the consumer tolerates it.
    """
    B, C, N = trans_ly.shape
    _, Cin, N0 = origin_f.shape
    assert conv_ly.shape == (B, C, N)
    Cout = params["w_d2"].shape[0]
    assert Cout == C, "final residual add requires outchannels == inchannels"
    assert C % 8 == 0, "channel count must be a multiple of 8 (sublane tiling)"
    if num_tiles is None:
        num_tiles = B
    assert B % num_tiles == 0, "num_tiles must divide the batch size"
    Bt = B // num_tiles

    md = jnp.dtype(matmul_dtype)
    f32 = jnp.float32

    # ---------------- host-side folding / packing (tiny, pure precompute) ----
    wg = (params["w_gate"] * params["s_gate"].reshape(1, C)).astype(md)    # (C, C)
    bias_gate = (params["w_gate"] @ params["b_gate"]).astype(f32)          # (C, 1)
    w_d1f = (params["w_d1"] * params["s_diff"]).astype(md)                 # (C, Cin)
    w_mlp = params["w_mlp"].astype(md)
    w_mlp1 = params["w_mlp1"].astype(md)
    w_d2 = params["w_d2"].astype(md)
    w_interp = params["w_interp"].astype(f32)      # exact lerp weights stay f32

    pad = jnp.zeros((C, 1), f32)
    vec = jnp.concatenate(
        [params["s_mlp"], params["b_mlp"], params["s_mlp1"], params["b_mlp1"],
         bias_gate, params["b_diff"], pad, pad], axis=1).astype(f32)       # (C, 8)

    def const(shape):
        return pl.BlockSpec(shape, lambda i, _s=shape: (0,) * len(_s))

    # ---------------- VMEM budget (explicit limit, 64 MiB v7x ceiling) -------
    def _nbytes(shape, dt):
        n = 1
        for d in shape:
            n *= int(d)
        return n * jnp.dtype(dt).itemsize

    act_est = 2 * (_nbytes((Bt, C, N), conv_ly.dtype)
                   + _nbytes((Bt, C, N), trans_ly.dtype)
                   + _nbytes((Bt, Cin, N0), origin_f.dtype)
                   + _nbytes((Bt, C, N), out_dtype))          # double-buffered blocks
    w_est = sum(int(a.size) * jnp.dtype(a.dtype).itemsize
                for a in (vec, w_mlp, w_mlp1, wg, w_d1f, w_d2, w_interp))
    vmem_limit = int(min(max(2 * (act_est + 2 * w_est) + (8 << 20), 32 << 20),
                         64 << 20))

    kernel = functools.partial(_point_diff_kernel, md=md, approx=approx_sigmoid)

    out = pl.pallas_call(
        kernel,
        out_shape=jax.ShapeDtypeStruct((B, C, N), out_dtype),
        grid=(num_tiles,),
        in_specs=[
            pl.BlockSpec((Bt, C, N), lambda i: (i, 0, 0)),     # conv_ly (native NCW)
            pl.BlockSpec((Bt, C, N), lambda i: (i, 0, 0)),     # trans_ly
            pl.BlockSpec((Bt, Cin, N0), lambda i: (i, 0, 0)),  # origin_f
            const((C, 8)),          # packed per-channel vectors
            const((C, C)),          # w_mlp
            const((C, C)),          # w_mlp1
            const((C, C)),          # s_gate-folded W_gate
            const((C, Cin)),        # s_diff-folded W_d1
            const((C, C)),          # W_d2
            const((N0, N)),         # shared interpolation matrix (f32)
        ],
        out_specs=pl.BlockSpec((Bt, C, N), lambda i: (i, 0, 0)),
        compiler_params=pltpu.CompilerParams(
            dimension_semantics=("parallel",),
            vmem_limit_bytes=vmem_limit),
    )(conv_ly, trans_ly, origin_f, vec, w_mlp, w_mlp1, wg, w_d1f, w_d2, w_interp)

    return out


def _linear_interp_matrix(n_in, n_out):
    # Exactly matches F.interpolate(mode='linear', align_corners=False).
    scale = n_in / n_out
    i = jnp.arange(n_out, dtype=jnp.float32)
    src = jnp.maximum((i + 0.5) * scale - 0.5, 0.0)
    i0 = jnp.minimum(jnp.floor(src).astype(jnp.int32), n_in - 1)
    i1 = jnp.minimum(i0 + 1, n_in - 1)
    lam = src - i0.astype(jnp.float32)
    cols = jnp.arange(n_out)
    w = jnp.zeros((n_in, n_out), jnp.float32)
    w = w.at[i0, cols].add(1.0 - lam)
    w = w.at[i1, cols].add(lam)
    return w


def make_params(key, inchannels, outchannels, in_channels, n0, n, eps=1e-5):
    ks = list(jax.random.split(key, 22))

    def bn_affine(kg, kb, km, kv, ch):
        gamma = 1.0 + 0.1 * jax.random.normal(kg, (ch,), jnp.float32)
        beta = 0.1 * jax.random.normal(kb, (ch,), jnp.float32)
        mean = 0.1 * jax.random.normal(km, (ch,), jnp.float32)
        var = jnp.abs(jax.random.normal(kv, (ch,), jnp.float32)) + 0.5
        scale = gamma / jnp.sqrt(var + eps)
        bias = beta - mean * scale
        return scale.reshape(ch, 1), bias.reshape(ch, 1)

    s_mlp, b_mlp = bn_affine(ks[0], ks[1], ks[2], ks[3], inchannels)
    s_mlp1, b_mlp1 = bn_affine(ks[4], ks[5], ks[6], ks[7], inchannels)
    s_gate, b_gate = bn_affine(ks[8], ks[9], ks[10], ks[11], inchannels)
    s_diff, b_diff = bn_affine(ks[12], ks[13], ks[14], ks[15], outchannels)

    w_mlp = 0.2 * jax.random.normal(ks[16], (inchannels, inchannels), jnp.float32)
    w_mlp1 = 0.2 * jax.random.normal(ks[17], (inchannels, inchannels), jnp.float32)
    w_gate = 0.2 * jax.random.normal(ks[18], (inchannels, inchannels), jnp.float32)
    w_d1 = 0.2 * jax.random.normal(ks[19], (outchannels, in_channels), jnp.float32)
    w_d2 = 0.2 * jax.random.normal(ks[20], (outchannels, outchannels), jnp.float32)

    return dict(
        w_mlp=w_mlp, s_mlp=s_mlp, b_mlp=b_mlp,
        w_mlp1=w_mlp1, s_mlp1=s_mlp1, b_mlp1=b_mlp1,
        w_gate=w_gate, s_gate=s_gate, b_gate=b_gate,
        w_d1=w_d1, w_d2=w_d2, s_diff=s_diff, b_diff=b_diff,
        w_interp=_linear_interp_matrix(n0, n),
    )


def _reference(conv_ly, trans_ly, origin_f, p):
    # Pure-JAX f32 reference of the original module forward (verification only).
    sig = lambda x: 1.0 / (1.0 + jnp.exp(-x))
    h = jnp.maximum(conv_ly * p["s_mlp"][None] + p["b_mlp"][None], 0.0)
    conv = sig(jnp.einsum("oc,bcn->bon", p["w_mlp"], h))
    h = jnp.maximum(trans_ly * p["s_mlp1"][None] + p["b_mlp1"][None], 0.0)
    trans = sig(jnp.einsum("oc,bcn->bon", p["w_mlp1"], h))
    d = jnp.einsum("oc,bcn->bon", p["w_d1"], origin_f)
    d = jnp.maximum(d * p["s_diff"][None] + p["b_diff"][None], 0.0)
    d = jnp.einsum("oc,bcn->bon", p["w_d2"], d)
    origin = jnp.einsum("bcm,mn->bcn", d, p["w_interp"])
    g = (conv + trans) * p["s_gate"][None] + p["b_gate"][None]
    z = sig(jnp.einsum("oc,bcn->bon", p["w_gate"], g))
    return (1.0 - z) * conv + z * trans + origin


if __name__ == "__main__":
    # Module config: pointDiff(inchannels=16, outchannels=16, in_channels=8)
    # (outchannels must equal the channel dim of trans_ly for the final add).
    B, C, Cin, N, N0 = 2, 16, 8, 128, 64

    key = jax.random.PRNGKey(0)
    k_c, k_t, k_o, k_p = jax.random.split(key, 4)
    conv_ly = jax.random.normal(k_c, (B, C, N), jnp.float32)
    trans_ly = jax.random.normal(k_t, (B, C, N), jnp.float32)
    origin_f = jax.random.normal(k_o, (B, Cin, N0), jnp.float32)
    params = make_params(k_p, inchannels=C, outchannels=C, in_channels=Cin,
                         n0=N0, n=N)

    ref = _reference(conv_ly, trans_ly, origin_f, params)

    # Default path: f32 operands, exact sigmoid, one batch per grid step.
    out = jax.block_until_ready(point_diff(conv_ly, trans_ly, origin_f, params))
    assert out.shape == (B, C, N)
    assert jnp.allclose(out, ref, atol=1e-4, rtol=1e-4), "f32 Pallas kernel mismatch"

    # Grouped-batch path (Bt=2 per step) exercises the in-kernel batch loop.
    out_g = jax.block_until_ready(
        point_diff(conv_ly, trans_ly, origin_f, params, num_tiles=1))
    assert jnp.allclose(out_g, ref, atol=1e-4, rtol=1e-4), "grouped-batch mismatch"

    # bf16 matmul-operand path (valid on v5e/v6e/v7x); exact sigmoid, f32
    # elementwise, f32 interpolation weights.
    out_bf = jax.block_until_ready(
        point_diff(conv_ly, trans_ly, origin_f, params, matmul_dtype=jnp.bfloat16))
    assert out_bf.shape == (B, C, N)
    assert jnp.allclose(out_bf, ref, atol=5e-2, rtol=5e-2), "bf16 Pallas kernel mismatch"

    print("KERNEL_OK")
</pallas_src>

<mosaic_0001>
module attributes {stable_mosaic.version = 11 : i64} {
  func.func @_point_diff_kernel(%arg0: i32, %arg1: memref<1x16x128xf32, #tpu.memory_space<vmem>>, %arg2: memref<1x16x128xf32, #tpu.memory_space<vmem>>, %arg3: memref<1x8x64xf32, #tpu.memory_space<vmem>>, %arg4: memref<16x8xf32, #tpu.memory_space<vmem>>, %arg5: memref<16x16xf32, #tpu.memory_space<vmem>>, %arg6: memref<16x16xf32, #tpu.memory_space<vmem>>, %arg7: memref<16x16xf32, #tpu.memory_space<vmem>>, %arg8: memref<16x8xf32, #tpu.memory_space<vmem>>, %arg9: memref<16x16xf32, #tpu.memory_space<vmem>>, %arg10: memref<64x128xf32, #tpu.memory_space<vmem>>, %arg11: memref<1x16x128xf32, #tpu.memory_space<vmem>>) attributes {dimension_semantics = [#tpu.dimension_semantics<parallel>], iteration_bounds = array<i64: 2>, scalar_prefetch = 0 : i64, scratch_operands = 0 : i64, tpu.core_type = #tpu.core_type<tc>, window_params = [{transform_indices = @transform_0, window_bounds = array<i64: 1, 16, 128>}, {transform_indices = @transform_1, window_bounds = array<i64: 1, 16, 128>}, {transform_indices = @transform_2, window_bounds = array<i64: 1, 8, 64>}, {pipeline_mode = #tpu.pipeline_mode<synchronous>, transform_indices = @transform_3, window_bounds = array<i64: 16, 8>}, {pipeline_mode = #tpu.pipeline_mode<synchronous>, transform_indices = @transform_4, window_bounds = array<i64: 16, 16>}, {pipeline_mode = #tpu.pipeline_mode<synchronous>, transform_indices = @transform_5, window_bounds = array<i64: 16, 16>}, {pipeline_mode = #tpu.pipeline_mode<synchronous>, transform_indices = @transform_6, window_bounds = array<i64: 16, 16>}, {pipeline_mode = #tpu.pipeline_mode<synchronous>, transform_indices = @transform_7, window_bounds = array<i64: 16, 8>}, {pipeline_mode = #tpu.pipeline_mode<synchronous>, transform_indices = @transform_8, window_bounds = array<i64: 16, 16>}, {pipeline_mode = #tpu.pipeline_mode<synchronous>, transform_indices = @transform_9, window_bounds = array<i64: 64, 128>}, {transform_indices = @transform_10, window_bounds = array<i64: 1, 16, 128>}]} {
    %c0 = arith.constant 0 : index
    %c0_0 = arith.constant 0 : index
    %0 = vector.load %arg4[%c0, %c0_0] : memref<16x8xf32, #tpu.memory_space<vmem>>, vector<16x8xf32>
    %1 = vector.extract_strided_slice %0 {offsets = [0, 0], sizes = [16, 1], strides = [1, 1]} : vector<16x8xf32> to vector<16x1xf32>
    %2 = vector.extract_strided_slice %0 {offsets = [0, 1], sizes = [16, 1], strides = [1, 1]} : vector<16x8xf32> to vector<16x1xf32>
    %3 = vector.extract_strided_slice %0 {offsets = [0, 2], sizes = [16, 1], strides = [1, 1]} : vector<16x8xf32> to vector<16x1xf32>
    %4 = vector.extract_strided_slice %0 {offsets = [0, 3], sizes = [16, 1], strides = [1, 1]} : vector<16x8xf32> to vector<16x1xf32>
    %5 = vector.extract_strided_slice %0 {offsets = [0, 4], sizes = [16, 1], strides = [1, 1]} : vector<16x8xf32> to vector<16x1xf32>
    %6 = vector.extract_strided_slice %0 {offsets = [0, 5], sizes = [16, 1], strides = [1, 1]} : vector<16x8xf32> to vector<16x1xf32>
    %c0_1 = arith.constant 0 : index
    %c0_2 = arith.constant 0 : index
    %7 = vector.load %arg5[%c0_1, %c0_2] : memref<16x16xf32, #tpu.memory_space<vmem>>, vector<16x16xf32>
    %c0_3 = arith.constant 0 : index
    %c0_4 = arith.constant 0 : index
    %8 = vector.load %arg6[%c0_3, %c0_4] : memref<16x16xf32, #tpu.memory_space<vmem>>, vector<16x16xf32>
    %c0_5 = arith.constant 0 : index
    %c0_6 = arith.constant 0 : index
    %9 = vector.load %arg7[%c0_5, %c0_6] : memref<16x16xf32, #tpu.memory_space<vmem>>, vector<16x16xf32>
    %c0_7 = arith.constant 0 : index
    %c0_8 = arith.constant 0 : index
    %10 = vector.load %arg8[%c0_7, %c0_8] : memref<16x8xf32, #tpu.memory_space<vmem>>, vector<16x8xf32>
    %c0_9 = arith.constant 0 : index
    %c0_10 = arith.constant 0 : index
    %11 = vector.load %arg9[%c0_9, %c0_10] : memref<16x16xf32, #tpu.memory_space<vmem>>, vector<16x16xf32>
    %c0_11 = arith.constant 0 : index
    %c0_12 = arith.constant 0 : index
    %12 = vector.load %arg10[%c0_11, %c0_12] : memref<64x128xf32, #tpu.memory_space<vmem>>, vector<64x128xf32>
    %c0_13 = arith.constant 0 : index
    %c0_14 = arith.constant 0 : index
    %c0_15 = arith.constant 0 : index
    %13 = vector.load %arg1[%c0_13, %c0_14, %c0_15] : memref<1x16x128xf32, #tpu.memory_space<vmem>>, vector<1x16x128xf32>
    %14 = vector.shape_cast %13 : vector<1x16x128xf32> to vector<16x128xf32>
    %15 = vector.broadcast %1 : vector<16x1xf32> to vector<16x128xf32>
    %16 = arith.mulf %14, %15 : vector<16x128xf32>
    %17 = vector.broadcast %2 : vector<16x1xf32> to vector<16x128xf32>
    %18 = arith.addf %16, %17 : vector<16x128xf32>
    %cst = arith.constant 0.000000e+00 : f32
    %19 = vector.broadcast %cst : f32 to vector<16x128xf32>
    %20 = arith.maximumf %18, %19 : vector<16x128xf32>
    %cst_16 = arith.constant dense<0.000000e+00> : vector<16x128xf32>
    %21 = tpu.matmul %7, %20, %cst_16 {dimension_numbers = #tpu.dot_dimension_numbers<[1], [0], [0], [1], [0, 0, 1, 1], [], []>} : vector<16x16xf32>, vector<16x128xf32>, vector<16x128xf32> -> vector<16x128xf32>
    %cst_17 = arith.constant 0.000000e+00 : f32
    %22 = vector.broadcast %cst_17 : f32 to vector<16x128xf32>
    %23 = arith.subf %22, %21 : vector<16x128xf32>
    %24 = math.exp %23 : vector<16x128xf32>
    %cst_18 = arith.constant 1.000000e+00 : f32
    %25 = vector.broadcast %cst_18 : f32 to vector<16x128xf32>
    %26 = arith.addf %25, %24 : vector<16x128xf32>
    %27 = tpu.reciprocal %26 : vector<16x128xf32> -> vector<16x128xf32>
    %c0_19 = arith.constant 0 : index
    %c0_20 = arith.constant 0 : index
    %c0_21 = arith.constant 0 : index
    %28 = vector.load %arg2[%c0_19, %c0_20, %c0_21] : memref<1x16x128xf32, #tpu.memory_space<vmem>>, vector<1x16x128xf32>
    %29 = vector.shape_cast %28 : vector<1x16x128xf32> to vector<16x128xf32>
    %30 = vector.broadcast %3 : vector<16x1xf32> to vector<16x128xf32>
    %31 = arith.mulf %29, %30 : vector<16x128xf32>
    %32 = vector.broadcast %4 : vector<16x1xf32> to vector<16x128xf32>
    %33 = arith.addf %31, %32 : vector<16x128xf32>
    %cst_22 = arith.constant 0.000000e+00 : f32
    %34 = vector.broadcast %cst_22 : f32 to vector<16x128xf32>
    %35 = arith.maximumf %33, %34 : vector<16x128xf32>
    %cst_23 = arith.constant dense<0.000000e+00> : vector<16x128xf32>
    %36 = tpu.matmul %8, %35, %cst_23 {dimension_numbers = #tpu.dot_dimension_numbers<[1], [0], [0], [1], [0, 0, 1, 1], [], []>} : vector<16x16xf32>, vector<16x128xf32>, vector<16x128xf32> -> vector<16x128xf32>
    %cst_24 = arith.constant 0.000000e+00 : f32
    %37 = vector.broadcast %cst_24 : f32 to vector<16x128xf32>
    %38 = arith.subf %37, %36 : vector<16x128xf32>
    %39 = math.exp %38 : vector<16x128xf32>
    %cst_25 = arith.constant 1.000000e+00 : f32
    %40 = vector.broadcast %cst_25 : f32 to vector<16x128xf32>
    %41 = arith.addf %40, %39 : vector<16x128xf32>
    %42 = tpu.reciprocal %41 : vector<16x128xf32> -> vector<16x128xf32>
    %43 = arith.addf %27, %42 : vector<16x128xf32>
    %cst_26 = arith.constant dense<0.000000e+00> : vector<16x128xf32>
    %44 = tpu.matmul %9, %43, %cst_26 {dimension_numbers = #tpu.dot_dimension_numbers<[1], [0], [0], [1], [0, 0, 1, 1], [], []>} : vector<16x16xf32>, vector<16x128xf32>, vector<16x128xf32> -> vector<16x128xf32>
    %45 = vector.broadcast %5 : vector<16x1xf32> to vector<16x128xf32>
    %46 = arith.addf %44, %45 : vector<16x128xf32>
    %cst_27 = arith.constant 0.000000e+00 : f32
    %47 = vector.broadcast %cst_27 : f32 to vector<16x128xf32>
    %48 = arith.subf %47, %46 : vector<16x128xf32>
    %49 = math.exp %48 : vector<16x128xf32>
    %cst_28 = arith.constant 1.000000e+00 : f32
    %50 = vector.broadcast %cst_28 : f32 to vector<16x128xf32>
    %51 = arith.addf %50, %49 : vector<16x128xf32>
    %52 = tpu.reciprocal %51 : vector<16x128xf32> -> vector<16x128xf32>
    %c0_29 = arith.constant 0 : index
    %c0_30 = arith.constant 0 : index
    %c0_31 = arith.constant 0 : index
    %53 = vector.load %arg3[%c0_29, %c0_30, %c0_31] : memref<1x8x64xf32, #tpu.memory_space<vmem>>, vector<1x8x64xf32>
    %54 = vector.shape_cast %53 : vector<1x8x64xf32> to vector<8x64xf32>
    %cst_32 = arith.constant dense<0.000000e+00> : vector<16x64xf32>
    %55 = tpu.matmul %10, %54, %cst_32 {dimension_numbers = #tpu.dot_dimension_numbers<[1], [0], [0], [1], [0, 0, 1, 1], [], []>} : vector<16x8xf32>, vector<8x64xf32>, vector<16x64xf32> -> vector<16x64xf32>
    %56 = vector.broadcast %6 : vector<16x1xf32> to vector<16x64xf32>
    %57 = arith.addf %55, %56 : vector<16x64xf32>
    %cst_33 = arith.constant 0.000000e+00 : f32
    %58 = vector.broadcast %cst_33 : f32 to vector<16x64xf32>
    %59 = arith.maximumf %57, %58 : vector<16x64xf32>
    %cst_34 = arith.constant dense<0.000000e+00> : vector<16x64xf32>
    %60 = tpu.matmul %11, %59, %cst_34 {dimension_numbers = #tpu.dot_dimension_numbers<[1], [0], [0], [1], [0, 0, 1, 1], [], []>} : vector<16x16xf32>, vector<16x64xf32>, vector<16x64xf32> -> vector<16x64xf32>
    %cst_35 = arith.constant dense<0.000000e+00> : vector<16x128xf32>
    %61 = tpu.matmul %60, %12, %cst_35 {dimension_numbers = #tpu.dot_dimension_numbers<[1], [0], [0], [1], [0, 0, 1, 1], [], []>} : vector<16x64xf32>, vector<64x128xf32>, vector<16x128xf32> -> vector<16x128xf32>
    %62 = arith.subf %42, %27 : vector<16x128xf32>
    %63 = arith.mulf %52, %62 : vector<16x128xf32>
    %64 = arith.addf %27, %63 : vector<16x128xf32>
    %65 = arith.addf %64, %61 : vector<16x128xf32>
    %c0_36 = arith.constant 0 : index
    %c0_37 = arith.constant 0 : index
    %c0_38 = arith.constant 0 : index
    %66 = vector.load %arg11[%c0_36, %c0_37, %c0_38] : memref<1x16x128xf32, #tpu.memory_space<vmem>>, vector<1x16x128xf32>
    %67 = vector.shape_cast %66 : vector<1x16x128xf32> to vector<16x128xf32>
    %68 = vector.shape_cast %65 : vector<16x128xf32> to vector<1x16x128xf32>
    tpu.vector_store %arg11[%c0_36, %c0_37, %c0_38], %68 {strides = array<i32>} : memref<1x16x128xf32, #tpu.memory_space<vmem>>, vector<1x16x128xf32>,
    return
  }
  func.func @transform_0(%arg0: i32) -> (i32, i32, i32) {
    %c0_i32 = arith.constant 0 : i32
    %c0_i32_0 = arith.constant 0 : i32
    %c0_i32_1 = arith.constant 0 : i32
    return %arg0, %c0_i32, %c0_i32_0 : i32, i32, i32
  }
  func.func @transform_1(%arg0: i32) -> (i32, i32, i32) {
    %c0_i32 = arith.constant 0 : i32
    %c0_i32_0 = arith.constant 0 : i32
    %c0_i32_1 = arith.constant 0 : i32
    return %arg0, %c0_i32, %c0_i32_0 : i32, i32, i32
  }
  func.func @transform_2(%arg0: i32) -> (i32, i32, i32) {
    %c0_i32 = arith.constant 0 : i32
    %c0_i32_0 = arith.constant 0 : i32
    %c0_i32_1 = arith.constant 0 : i32
    return %arg0, %c0_i32, %c0_i32_0 : i32, i32, i32
  }
  func.func @transform_3(%arg0: i32) -> (i32, i32) {
    %c0_i32 = arith.constant 0 : i32
    %c0_i32_0 = arith.constant 0 : i32
    %c0_i32_1 = arith.constant 0 : i32
    return %c0_i32, %c0_i32_0 : i32, i32
  }
  func.func @transform_4(%arg0: i32) -> (i32, i32) {
    %c0_i32 = arith.constant 0 : i32
    %c0_i32_0 = arith.constant 0 : i32
    %c0_i32_1 = arith.constant 0 : i32
    return %c0_i32, %c0_i32_0 : i32, i32
  }
  func.func @transform_5(%arg0: i32) -> (i32, i32) {
    %c0_i32 = arith.constant 0 : i32
    %c0_i32_0 = arith.constant 0 : i32
    %c0_i32_1 = arith.constant 0 : i32
    return %c0_i32, %c0_i32_0 : i32, i32
  }
  func.func @transform_6(%arg0: i32) -> (i32, i32) {
    %c0_i32 = arith.constant 0 : i32
    %c0_i32_0 = arith.constant 0 : i32
    %c0_i32_1 = arith.constant 0 : i32
    return %c0_i32, %c0_i32_0 : i32, i32
  }
  func.func @transform_7(%arg0: i32) -> (i32, i32) {
    %c0_i32 = arith.constant 0 : i32
    %c0_i32_0 = arith.constant 0 : i32
    %c0_i32_1 = arith.constant 0 : i32
    return %c0_i32, %c0_i32_0 : i32, i32
  }
  func.func @transform_8(%arg0: i32) -> (i32, i32) {
    %c0_i32 = arith.constant 0 : i32
    %c0_i32_0 = arith.constant 0 : i32
    %c0_i32_1 = arith.constant 0 : i32
    return %c0_i32, %c0_i32_0 : i32, i32
  }
  func.func @transform_9(%arg0: i32) -> (i32, i32) {
    %c0_i32 = arith.constant 0 : i32
    %c0_i32_0 = arith.constant 0 : i32
    %c0_i32_1 = arith.constant 0 : i32
    return %c0_i32, %c0_i32_0 : i32, i32
  }
  func.func @transform_10(%arg0: i32) -> (i32, i32, i32) {
    %c0_i32 = arith.constant 0 : i32
    %c0_i32_0 = arith.constant 0 : i32
    %c0_i32_1 = arith.constant 0 : i32
    return %arg0, %c0_i32, %c0_i32_0 : i32, i32, i32
  }
}

</mosaic_0001>

<bundles_post_ra>
// kernel: tpu_custom_call.1
= control target key start
LH: loop header
LB: loop body
LE: loop exit
PB: predicated region body
PF: predicated region fallthrough
CT: control target
= control target key end

     0   :  { %s2289_s0 = inlined_call_operand.hbm [shape: f32[2,16,128], index: 0, kind: input, shape index: {}]   ;;  %s2290_s1 = inlined_call_operand.hbm [shape: f32[2,16,128], index: 1, kind: input, shape index: {}]   ;;  %s2291_s2 = inlined_call_operand.hbm [shape: f32[2,8,64], index: 2, kind: input, shape index: {}]   ;;  %s2292_s3 = inlined_call_operand.vmem [shape: f32[16,8], index: 3, kind: input, shape index: {}]   ;;  %s2293_s4 = inlined_call_operand.hbm [shape: f32[16,16], index: 4, kind: input, shape index: {}]   ;;  %s2294_s5 = inlined_call_operand.hbm [shape: f32[16,16], index: 5, kind: input, shape index: {}]   ;;  %s2295_s6 = inlined_call_operand.hbm [shape: f32[16,16], index: 6, kind: input, shape index: {}]   ;;  %s2296_s7 = inlined_call_operand.vmem [shape: f32[16,8], index: 7, kind: input, shape index: {}]   ;;  %s2297_s8 = inlined_call_operand.hbm [shape: f32[16,16], index: 8, kind: input, shape index: {}]   ;;  %s2298_s9 = inlined_call_operand.vmem [shape: f32[64,128], index: 9, kind: input, shape index: {}]   ;;  %s2299_s10 = inlined_call_operand.hbm [shape: f32[2,16,128], index: 10, kind: output, shape index: {}]  }
   0x1   :  { %2319 = sst [smem:[#allocation25_spill]] %s2289_s0 }
   0x2   :  { %2320 = sst [smem:[#allocation26_spill]] %s2290_s1 }
   0x3   :  { %2321 = sst [smem:[#allocation27_spill]] %s2293_s4 }
   0x4   :  { %2322 = sst [smem:[#allocation28_spill]] %s2294_s5 }
   0x5   :  { %2323 = sst [smem:[#allocation29_spill]] %s2295_s6 }
   0x6   :  { %2324 = sst [smem:[#allocation30_spill]] %s2297_s8 }
   0x7   :  { %2325 = sst [smem:[#allocation31_spill]] %s2299_s10 }
   0x8   :  { %15 = vsyncpa [#allocation3], 0 }
   0x9   :  { %17 = vsyncpa [#allocation3 + $0x1], 0 }
   0xa   :  { %18 = vsyncpa [#allocation6], 0 }
   0xb   :  { %20 = vsyncpa [#allocation6 + $0x1], 0 }
   0xc   :  { %21 = vsyncpa [#allocation9], 0 }
   0xd   :  { %22 = vsyncpa [#allocation12], 0 }
   0xe   :  { %23 = vsyncpa [#allocation4], 0 }
   0xf   :  { %25 = vsyncpa [#allocation4 + $0x1], 0  ;;  %s1903_s13 = smov 0   ;;  %s1905_s14 = smov 0  }
  0x10   :  { %s1907_s15 = smov 0   ;;  %s1909_s16 = smov 0  }
  0x11 LB: > { %2326 = sst [smem:[#allocation20_spill]] %s1816_s13  ;;  %s1924_s17 = sadd.s32 4294967295, %s1828_s16   ;;  %s1828_s16 = sphi %s1909_s16, %s2363_s16   ;;  %s1824_s15 = sphi %s1907_s15, %s2365_s15   ;;  %s1820_s14 = sphi %s1905_s14, %s2367_s14   ;;  %s1816_s13 = sphi %s1903_s13, %s2366_s13  }
  0x12   : > { %2327 = sst [smem:[#allocation21_spill]] %s1824_s15  ;;  %s1298_s18 = sadd.s32 4294967294, %s1828_s16  }
  0x13   : > { %p51_p0 = scmp.ne.s32.totalorder %s1820_s14, %s1816_s13  ;;  %p2310_p1 = scmp.eq.s32.totalorder %s1924_s17, 0 }
  0x14   : > { %p274_p2 = scmp.eq.s32.totalorder %s1924_s17, 1  ;;  %p280_p3 = scmp.eq.s32.totalorder %s1298_s18, 1 }
  0x15   : > { %p1933_p4 = por %p2310_p1, %p51_p0  ;;  %p1299_p5 = scmp.ge.s32.totalorder %s1828_s16, 1 }
  0x16   : > { %p1938_p6 = por %p280_p3, %p51_p0  ;;  %p287_p7 = scmp.lt.s32.totalorder %s1828_s16, 3 }
  0x17   : > { %s2328_s19 = scalar_select %p1933_p4, 1, 0 }
  0x18   : > { %s2329_s20 = scalar_select %p1938_p6, 1, 0 }
  0x19   : > { %p1943_p8 = pnand %p1299_p5, %p287_p7  ;;  %s1830_s22 = smov [#allocation8]  }
  0x1a   : > { %2330 = sst [smem:[#allocation22_spill]] %s2329_s20  ;;  %s302_s23 = sshll.u32 %s1830_s22, 4  ;;  %s303_s23 = int_to_ptr.vmem [resolvable:$true] %s302_s23 }
  0x1b   : > { %s2331_s21 = scalar_select %p1943_p8, 1, 0 }
  0x1c   : > { %p1447_p9 = pneg %p1943_p8  ;;  %s1831_s25 = smov [#allocation11]  }
  0x1d   : > { %s328_s26 = sshll.u32 %s1831_s25, 4  ;;  %s1575_s27 = scalar_lea.vmem %s303_s23, 256  ;;  %s329_s26 = int_to_ptr.vmem [resolvable:$true] %s328_s26 }
  0x1e   : > { %p1952_p11 = pnand %p1447_p9, %p2310_p1  ;;  %p1576_p13 = scmp.ne.s32.totalorder %s303_s23, %s1575_s27 }
  0x1f   : > { %p1583_p5 = scmp.lt.s32.totalorder %s303_s23, %s303_s23  ;;  %p1584_p7 = scmp.lt.s32.totalorder %s1575_s27, %s1575_s27 }
  0x20   : > { %s2332_s24 = scalar_select %p1952_p11, 1, 0 }
  0x21   : > { %p2311_p12 = pneg %p1952_p11  ;;  %p1585_p10 = por %p1584_p7, %p1583_p5 }
  0x23   : > { %p1578_p0 = pnand %p1576_p13, %p2311_p12 }
  0x25   : > { %p1579_p3 = pneg %p1578_p0 }
  0x27   : > { %p1586_p9 = pnand %p1585_p10, %p1579_p3 }
  0x29   : > { %1589 = shalt.err (!%p1586_p9)
}
  0x2a   : > { %s2300_s28 = smov 128   ;;  %s2302_s29 = smov 8  }
  0x2b   : > { %s2333_s4 = sld [smem:[#allocation27_spill]]  ;;  %s1601_s12 = scalar_lea.vmem %s329_s26, 256 }
  0x2c   : > { %p1602_p13 = scmp.ne.s32.totalorder %s329_s26, %s1601_s12  ;;  %p1609_p10 = scmp.lt.s32.totalorder %s329_s26, %s329_s26 }
  0x2d   : > { %p1610_p3 = scmp.lt.s32.totalorder %s1601_s12, %s1601_s12 }
  0x2e   : > { %p1604_p0 = pnand %p1602_p13, %p2311_p12 }
  0x2f   : > { %p1611_p7 = por %p1610_p3, %p1609_p10 }
  0x30   : > { %p1605_p5 = pneg %p1604_p0 }
  0x31   : > { %1450 = dma.hbm_to_vmem [thread:$0]  (!%p1952_p11), %s2333_s4, 256, %s303_s23, [#allocation9], %s2300_s28, %s2300_s28, %s2302_s29  }
  0x32   : > { %p1612_p9 = pnand %p1611_p7, %p1605_p5 }
  0x34   : > { %1615 = shalt.err (!%p1612_p9)
}
  0x35   : > { %s2334_s6 = sld [smem:[#allocation29_spill]]  ;;  %s1981_s23 = sadd.s32 1, %s1828_s16  }
  0x36   : > { %2335 = sst [smem:[#allocation23_spill]] %s1981_s23  ;;  %s38_s25 = sadd.s32 1, %s1824_s15 }
  0x37   : > { %s35_s27 = ssub.s32 %s1828_s16, %s1981_s23  ;;  %p45_p13 = scmp.ne.s32.totalorder %s1824_s15, %s1820_s14 }
  0x38   : > { %p36_p0 = scmp.eq.s32.totalorder %s35_s27, 0  ;;  %p46_p5 = scmp.eq.s32.totalorder %s1828_s16, 0 }
  0x39   : > { %p1991_p10 = por %p274_p2, %p45_p13  ;;  %p1478_p3 = scmp.lt.s32.totalorder %s1828_s16, 2 }
  0x3a   : > { %s1997_s11 = scalar_select %p36_p0, %s1824_s15, %s38_s25  }
  0x3b   : > { %1456 = dma.hbm_to_vmem [thread:$0]  (!%p1952_p11), %s2334_s6, 256, %s329_s26, [#allocation12], %s2300_s28, %s2300_s28, %s2302_s29  }
  0x3c   : > { %s2336_s30 = scalar_select %p1991_p10, 1, 0 }
  0x3d   : > { %2337 = sst [smem:[#allocation24_spill]] %s1997_s11  ;;  %p47_p7 = por %p46_p5, %p45_p13 }
  0x3e   : > { %s2000_s12 = sand.u32 1, %s1824_s15   ;;  %s2309_s18 = sshll.u32 %s1828_s16, 8 }
  0x3f   : > { %s2308_s26 = sshll.u32 %s2000_s12, 4  ;;  %p2004_p9 = pnand %p1478_p3, %p47_p7 }
  0x40   : > { %s382_s27 = sand.u32 1, %s1828_s16   ;;  %s2339_s1 = sld [smem:[#allocation26_spill]] }
  0x41   : > { %s386_s25 = scalar_lea.vmem [#allocation5], %s2308_s26  ;;  %s1834_s11 = smov [#allocation10]  }
  0x42   : > { %s393_s6 = sshll.u32 %s386_s25, 4  ;;  %s2020_s15 = sshll.u32 %s1834_s11, 4  ;;  %s2018_s6 = int_to_ptr.vmem [resolvable:$true] %s393_s6  ;;  %s316_s15 = int_to_ptr.vmem [resolvable:$true] %s2020_s15 }
  0x43   : > { %s2022_s23 = scalar_lea.sflag [#allocation6], %s382_s27  ;;  %p2028_p13 = pneg %p2004_p9 }
  0x46   : > { %s2014_s4 = scalar_lea.hbm %s2339_s1, %s2309_s18  ;;  %s1621_s26 = scalar_lea.hbm %s2339_s1, 512 }
  0x47   : > { %s1616_s20 = scalar_lea.hbm %s2014_s4, 256  ;;  %p1622_p3 = scmp.lt.s32.totalorder %s2014_s4, %s2339_s1 }
  0x48   : > { %p1617_p2 = scmp.ne.s32.totalorder %s2014_s4, %s1616_s20  ;;  %p1623_p7 = scmp.lt.s32.totalorder %s1621_s26, %s1616_s20 }
  0x4a   : > { %p1619_p0 = pnand %p2028_p13, %p1617_p2  ;;  %p1624_p1 = por %p1623_p7, %p1622_p3 }
  0x4c   : > { %p1620_p5 = pneg %p1619_p0 }
  0x4e   : > { %p1625_p12 = pnand %p1624_p1, %p1620_p5 }
  0x50   : > { %1628 = shalt.err (!%p1625_p12)
}
  0x51   : > { %s1629_s27 = scalar_lea.vmem %s2018_s6, 256  ;;  %s1835_s13 = smov [#allocation5]  }
  0x52   : > { %p1630_p6 = scmp.ne.s32.totalorder %s2018_s6, %s1629_s27  ;;  %s1634_s29 = sshll.u32 %s1835_s13, 4  ;;  %s1635_s29 = int_to_ptr.vmem [resolvable:$false] %s1634_s29 }
  0x53   : > { %s1636_s25 = scalar_lea.vmem %s1635_s29, 512  ;;  %p1637_p10 = scmp.lt.s32.totalorder %s2018_s6, %s1635_s29 }
  0x54   : > { %p1632_p2 = pnand %p1630_p6, %p2028_p13  ;;  %p1638_p4 = scmp.lt.s32.totalorder %s1636_s25, %s1629_s27 }
  0x56   : > { %p1633_p0 = pneg %p1632_p2  ;;  %p1639_p8 = por %p1638_p4, %p1637_p10 }
  0x58   : > { %p1640_p11 = pnand %p1639_p8, %p1633_p0 }
  0x5a   : > { %1643 = shalt.err (!%p1640_p11)
}
  0x5b   : > { %s2341_s20 = smov 8   ;;  %s2342_s26 = smov 128  }
  0x5c   : > { %1466 = dma.hbm_to_vmem [thread:$0]  (!%p2004_p9), %s2014_s4, 256, %s2018_s6, %s2022_s23, %s2342_s26, %s2342_s26, %s2341_s20  }
  0x5d   : > { %s1655_s13 = scalar_lea.vmem %s316_s15, 256  ;;  %p2343_p6 = scmp.ne.s32.totalorder %s2332_s24, 0 }
  0x5e   : > { %p1656_p1 = scmp.ne.s32.totalorder %s316_s15, %s1655_s13  ;;  %p1663_p8 = scmp.lt.s32.totalorder %s316_s15, %s316_s15 }
  0x5f   : > { %p2344_p12 = pneg %p2343_p6  ;;  %p1664_p11 = scmp.lt.s32.totalorder %s1655_s13, %s1655_s13 }
  0x61   : > { %p1658_p5 = pnand %p1656_p1, %p2344_p12  ;;  %p1665_p10 = por %p1664_p11, %p1663_p8 }
  0x63   : > { %p1659_p4 = pneg %p1658_p5 }
  0x65   : > { %p1666_p3 = pnand %p1665_p10, %p1659_p4 }
  0x67   : > { %1669 = shalt.err (!%p1666_p3)
}
  0x68   : > { %s2345_s5 = sld [smem:[#allocation28_spill]]  ;;  %s1836_s4 = smov [#allocation13]  }
  0x69   : > { %s344_s6 = sshll.u32 %s1836_s4, 4  ;;  %p2346_p2 = pmov %p2344_p12  ;;  %s345_s6 = int_to_ptr.vmem [resolvable:$true] %s344_s6 }
  0x6a   : > { %s1681_s27 = scalar_lea.vmem %s345_s6, 256  ;;  %p1689_p12 = scmp.lt.s32.totalorder %s345_s6, %s345_s6 }
  0x6b   : > { %p1682_p7 = scmp.ne.s32.totalorder %s345_s6, %s1681_s27  ;;  %p1690_p5 = scmp.lt.s32.totalorder %s1681_s27, %s1681_s27 }
  0x6d   : > { %p1684_p0 = pnand %p1682_p7, %p2346_p2  ;;  %p1691_p4 = por %p1690_p5, %p1689_p12 }
  0x6e   : > { %1453 = dma.hbm_to_vmem [thread:$0]  (!%p2343_p6), %s2345_s5, 256, %s316_s15, [#allocation9], %s2342_s26, %s2342_s26, %s2341_s20  }
  0x6f   : > { %p1685_p1 = pneg %p1684_p0 }
  0x71   : > { %p1692_p8 = pnand %p1691_p4, %p1685_p1 }
  0x73   : > { %1695 = shalt.err (!%p1692_p8)
}
  0x74   : > { %s2347_s8 = sld [smem:[#allocation30_spill]]  ;;  %s2348_s25 = sshll.u32 %s1828_s16, 8 }
  0x75   : > { %s2349_s0 = sld [smem:[#allocation25_spill]]  ;;  %s2350_s4 = sshll.u32 %s2000_s12, 4 }
  0x76   : > { %s365_s24 = scalar_lea.vmem [#allocation2], %s2350_s4  ;;  %s1311_s15 = sshll.u32 %s2000_s12, 3 }
  0x77   : > { %s372_s27 = sshll.u32 %s365_s24, 4  ;;  %s362_s29 = scalar_lea.sflag [#allocation3], %s2000_s12  ;;  %s2086_s27 = int_to_ptr.vmem [resolvable:$true] %s372_s27 }
  0x7a   : > { %1459 = dma.hbm_to_vmem [thread:$0]  (!%p2343_p6), %s2347_s8, 256, %s345_s6, [#allocation12], %s2342_s26, %s2342_s26, %s2341_s20  }
  0x7b   : > { %s2082_s11 = scalar_lea.hbm %s2349_s0, %s2348_s25  ;;  %s1701_s25 = scalar_lea.hbm %s2349_s0, 512 }
  0x7c   : > { %s1696_s1 = scalar_lea.hbm %s2082_s11, 256  ;;  %p1702_p3 = scmp.lt.s32.totalorder %s2082_s11, %s2349_s0 }
  0x7d   : > { %p1697_p11 = scmp.ne.s32.totalorder %s2082_s11, %s1696_s1  ;;  %p1703_p7 = scmp.lt.s32.totalorder %s1701_s25, %s1696_s1 }
  0x7f   : > { %p1699_p6 = pnand %p1697_p11, %p2028_p13  ;;  %p1704_p2 = por %p1703_p7, %p1702_p3 }
  0x81   : > { %p1700_p10 = pneg %p1699_p6 }
  0x83   : > { %p1705_p0 = pnand %p1704_p2, %p1700_p10 }
  0x85   : > { %1708 = shalt.err (!%p1705_p0)
}
  0x86   : > { %s1709_s4 = scalar_lea.vmem %s2086_s27, 256  ;;  %s1837_s24 = smov [#allocation2]  }
  0x87   : > { %p1710_p1 = scmp.ne.s32.totalorder %s2086_s27, %s1709_s4  ;;  %s1714_s5 = sshll.u32 %s1837_s24, 4  ;;  %s1715_s5 = int_to_ptr.vmem [resolvable:$false] %s1714_s5 }
  0x88   : > { %s1716_s6 = scalar_lea.vmem %s1715_s5, 512  ;;  %p1717_p4 = scmp.lt.s32.totalorder %s2086_s27, %s1715_s5 }
  0x89   : > { %p1712_p12 = pnand %p1710_p1, %p2028_p13  ;;  %p1718_p8 = scmp.lt.s32.totalorder %s1716_s6, %s1709_s4 }
  0x8b   : > { %p1713_p5 = pneg %p1712_p12  ;;  %p1719_p11 = por %p1718_p8, %p1717_p4 }
  0x8d   : > { %p1720_p6 = pnand %p1719_p11, %p1713_p5 }
  0x8f   : > { %1723 = shalt.err (!%p1720_p6)
}
  0x90   : > { %1463 = dma.hbm_to_vmem [thread:$0]  (!%p2004_p9), %s2082_s11, 256, %s2086_s27, %s362_s29, %s2342_s26, %s2342_s26, %s2341_s20  }
  0x91   : > { %s1312_s1 = sshll.u32 %s1828_s16, 7  ;;  %s407_s4 = scalar_lea.vmem [#allocation7], %s1311_s15 }
  0x92   : > { %s412_s18 = scalar_lea.hbm %s2291_s2, %s1312_s1  ;;  %s414_s24 = sshll.u32 %s407_s4, 4  ;;  %s415_s24 = int_to_ptr.vmem [resolvable:$true] %s414_s24 }
  0x93   : > { %s1724_s5 = scalar_lea.hbm %s412_s18, 128  ;;  %s1729_s8 = scalar_lea.hbm %s2291_s2, 256 }
  0x94   : > { %p1725_p10 = scmp.ne.s32.totalorder %s412_s18, %s1724_s5  ;;  %p1730_p2 = scmp.lt.s32.totalorder %s412_s18, %s2291_s2 }
  0x95   : > { %p1731_p0 = scmp.lt.s32.totalorder %s1729_s8, %s1724_s5 }
  0x96   : > { %p1727_p3 = pnand %p1725_p10, %p2028_p13 }
  0x97   : > { %p1732_p1 = por %p1731_p0, %p1730_p2 }
  0x98   : > { %p1728_p7 = pneg %p1727_p3 }
  0x9a   : > { %p1733_p12 = pnand %p1732_p1, %p1728_p7 }
  0x9c   : > { %1736 = shalt.err (!%p1733_p12)
}
  0x9d   : > { %s1737_s12 = scalar_lea.vmem %s415_s24, 128  ;;  %s1838_s26 = smov [#allocation7]  }
  0x9e   : > { %p1738_p5 = scmp.ne.s32.totalorder %s415_s24, %s1737_s12  ;;  %s1742_s11 = sshll.u32 %s1838_s26, 4  ;;  %s1743_s11 = int_to_ptr.vmem [resolvable:$false] %s1742_s11 }
  0x9f   : > { %s1744_s27 = scalar_lea.vmem %s1743_s11, 256  ;;  %p1745_p11 = scmp.lt.s32.totalorder %s415_s24, %s1743_s11 }
  0xa0   : > { %p1740_p4 = pnand %p1738_p5, %p2028_p13  ;;  %p1746_p6 = scmp.lt.s32.totalorder %s1744_s27, %s1737_s12 }
  0xa2   : > { %p1741_p8 = pneg %p1740_p4  ;;  %p1747_p10 = por %p1746_p6, %p1745_p11 }
  0xa4   : > { %p1748_p3 = pnand %p1747_p10, %p1741_p8 }
  0xa6   : > { %1751 = shalt.err (!%p1748_p3)
}
  0xa7   : > { %1469 = dma.hbm_to_vmem [thread:$0]  (!%p2004_p9), %s412_s18, 128, %s415_s24, %s2022_s23  }
  0xa8   : > { %p2351_p7 = scmp.ne.s32.totalorder %s2331_s21, 0 }
  0xa9   : > { %s2135_s0 = sand.u32 (!%p2351_p7), 1, %s1820_s14   ;;  %p2352_p13 = scmp.ne.s32.totalorder (!%p2351_p7), %s2328_s19, 0 }
  0xaa   : > { %423 = sbr.rel (%p2351_p7) target bundleno = 978 (0x3d2), region = 60  ;;  %s2138_s8 = sshll.u32 (!%p2351_p7), %s2135_s0, 4 }
  0xab   : > { %s426_s10 = scalar_lea.sflag (!%p2351_p7), [#allocation3], %s2135_s0  ;;  %s429_s28 = scalar_lea.vmem (!%p2351_p7), [#allocation2], %s2138_s8 }
  0xaf   : > { %1795 = dma.done.wait (%p2352_p13), %s426_s10, 256  }
  0xb0   : > { %1797 = vsyncadd (%p2352_p13), %s426_s10, 4294967040  ;;  %s434_s21 = sand.u32 1, %s1924_s17   ;;  %s438_s22 = scalar_lea.vmem [#allocation5], %s2138_s8 }
  0xb1   : > { %s435_s23 = scalar_lea.sflag [#allocation6], %s434_s21 }
  0xb2   : > { %1799 = dma.done.wait (%p2352_p13), %s435_s23, 384  }
  0xb3   : > { %1801 = vsyncadd (%p2352_p13), %s435_s23, 4294966912  ;;  %s1316_s15 = sshll.u32 %s2135_s0, 3  ;;  %p2353_p9 = scmp.eq.s32.totalorder %s1924_s17, 0 }
  0xb4   : > { %s447_s29 = scalar_lea.vmem [#allocation7], %s1316_s15 }
  0xb5   : > { %1803 = dma.done.wait (%p2353_p9), [#allocation9], 512   ;;  %p2354_p2 = pmov %p2353_p9 }
  0xb7   : > { %1805 = vsyncadd (%p2354_p2), [#allocation9], 4294966784  ;;  %p2355_p0 = pmov %p2354_p2 }
  0xb9   : > { %1807 = dma.done.wait (%p2355_p0), [#allocation12], 512   ;;  %p2356_p1 = pmov %p2355_p0 }
  0xba   : > { %v1839_v0 = vmov 1   ;;  %v1840_v1 = vmov 0   ;;  %v2164_v2 = vld [vmem:[%s2292_s3 + $0x8] sm:$0xff]  ;;  %v2171_v3 = vld [vmem:[%s2292_s3] sm:$0xff]  ;;  %v1841_v4 = vmov 2   ;;  %v512_v5 = vld [vmem:[#allocation8] sm:$0xff] }
  0xbb   : > { %1809 = vsyncadd (%p2356_p1), [#allocation12], 4294966784  ;;  %1531 = vset.pattern.permute.xlu1 %v1839_v0  ;;  %1530 = vset.pattern.permute.xlu0 %v1840_v1  ;;  %vm556_vm0 = vcmask 130048   ;;  %v1842_v6 = vmov 3   ;;  %v864_v7 = vld [vmem:[%s447_s29] sm:$0xff]  ;;  %vm873_vm1 = vcmask 64512  }
  0xbc   : > { %549 = vperm.xlu1 %1531, %v2164_v2   ;;  %539 = vperm.xlu0 %1530, %v2164_v2   ;;  %v518_v8 = vld [vmem:[%s2296_s7] sm:$0xff]  ;;  %v519_v9 = vld [vmem:[%s2296_s7 + $0x8] sm:$0xff]  ;;  %v1843_v10 = vmov 5   ;;  %v513_v27 = vld [vmem:[#allocation8 + $0x8] sm:$0xff]  ;;  %v1844_v40 = vmov 4   ;;  %vm1038_vm2 = vcmask 523264  }
  0xbd   : > { %1375 = vmatprep.mubr.msk.f32.mxu0 %vm556_vm0, %v512_v5  ;;  %1392 = vmatprep.subr.mxu1 %v864_v7  ;;  %v531_v11 = vld [vmem:[%s429_s28 + $0x8] sm:$0xff]  ;;  %v530_v15 = vld [vmem:[%s429_s28] sm:$0xff]  ;;  %s509_s13 = scalar_lea.vmem [#allocation14], %s2138_s8  ;;  %s1341_s4 = sshll.u32 %s1924_s17, 8 }
  0xbe   : > { %1394 = vmatprep.mubr.msk.f32.mxu1 %vm873_vm1, %v518_v8  ;;  %1393 = vmatpush3.msra.mxu1 %v864_v7  ;;  %v649_v22 = vld [vmem:[%s438_s22 + $0x8] sm:$0xff]  ;;  %v648_v26 = vld [vmem:[%s438_s22] sm:$0xff]  ;;  %s1144_s18 = sshll.u32 %s509_s13, 4  ;;  %s2357_s6 = sld [smem:[#allocation31_spill]]  ;;  %s2240_s18 = int_to_ptr.vmem [resolvable:$true] %s1144_s18 }
  0xbf   : > { %1395 = vmatmul.mubr.msk.f32.vlgmr.msra.gmra.mxu1 %vm873_vm1, %v519_v9  ;;  %v514_v29 = vld [vmem:[#allocation10] sm:$0xff]  ;;  %v515_v37 = vld [vmem:[#allocation10 + $0x8] sm:$0xff]  ;;  %v516_v38 = vld [vmem:[#allocation11] sm:$0xff]  ;;  %s1131_s8 = scalar_lea.sflag [#allocation4], %s2135_s0  ;;  %s1752_s17 = scalar_lea.vmem %s2240_s18, 256 }
  0xc0   : > { %545 = vperm.xlu1 %1531, %v2171_v3   ;;  %534 = vperm.xlu0 %1530, %v2171_v3   ;;  %v529_v39 = vld [vmem:[%s2298_s9 + $0x38] sm:$0xff]  ;;  %v528_v41 = vld [vmem:[%s2298_s9 + $0x30] sm:$0xff]  ;;  %v527_v42 = vld [vmem:[%s2298_s9 + $0x28] sm:$0xff]  ;;  %p1753_p12 = scmp.ne.s32.totalorder %s2240_s18, %s1752_s17  ;;  %p2358_p5 = scmp.ne.s32.totalorder %s2336_s30, 0 }
  0xc1   : > { %1404 = vmatprep.subr.mxu1 %v529_v39  ;;  %v526_v43 = vld [vmem:[%s2298_s9 + $0x20] sm:$0xff]  ;;  %v525_v44 = vld [vmem:[%s2298_s9 + $0x18] sm:$0xff]  ;;  %s1845_s12 = smov [#allocation14]  }
  0xc2   : > { %1405 = vmatpush3.msra.mxu1 %v529_v39  ;;  %p1754_p4 = pnand %p1753_p12, %p2358_p5  ;;  %s1756_s26 = sshll.u32 %s1845_s12, 4  ;;  %s1757_s26 = int_to_ptr.vmem [resolvable:$false] %s1756_s26 }
  0xc3   : > { %1406 = vmatprep.subr.mxu1 %v528_v41  ;;  %s1758_s11 = scalar_lea.vmem %s1757_s26, 512  ;;  %p1759_p11 = scmp.lt.s32.totalorder %s2240_s18, %s1757_s26 }
  0xc4   : > { %1533 = vset.pattern.permute.xlu1 %v1841_v4  ;;  %1532 = vset.pattern.permute.xlu0 %v1841_v4  ;;  %s2246_s20 = scalar_lea.hbm %s2357_s6, %s1341_s4  ;;  %p1755_p8 = pneg %p1754_p4 }
  0xc5   : > { %651 = vperm.xlu1 %1533, %v2171_v3   ;;  %655 = vperm.xlu0 %1532, %v2164_v2   ;;  %p1760_p6 = scmp.lt.s32.totalorder %s1758_s11, %s1752_s17 }
  0xc6   : > { %1407 = vmatpush3.msra.mxu1 %v528_v41 }
  0xc7   : > { %1408 = vmatprep.subr.mxu1 %v527_v42  ;;  %p1761_p10 = por %p1760_p6, %p1759_p11 }
  0xc8   : > { %1409 = vmatpush3.msra.mxu1 %v527_v42 }
  0xc9   : > { %1534 = vset.pattern.permute.xlu1 %v1842_v6  ;;  %1535 = vset.pattern.permute.xlu0 %v1842_v6  ;;  %p1762_p3 = pnand %p1761_p10, %p1755_p8 }
  0xca   : > { %665 = vperm.xlu1 %1534, %v2164_v2   ;;  %661 = vperm.xlu0 %1535, %v2171_v3  }
  0xcb   : > { %1410 = vmatprep.subr.mxu1 %v526_v43 }
  0xcc   : > { %1411 = vmatpush3.msra.mxu1 %v526_v43 }
  0xcd   : > { %1412 = vmatprep.subr.mxu1 %v525_v44 }
  0xce   : > { %1536 = vset.pattern.permute.xlu1 %v1843_v10  ;;  %1537 = vset.pattern.permute.xlu0 %v1844_v40 }
  0xcf   : > { %870 = vperm.xlu1 %1536, %v2164_v2   ;;  %766 = vperm.xlu0 %1537, %v2171_v3  }
  0xd0   : > { %1413 = vmatpush3.msra.mxu1 %v525_v44 }
  0xd3   : > { %866 = vperm.xlu1 %1536, %v2171_v3   ;;  %1539 = vset.pattern.permute.xlu0 %v1843_v10 }
  0xd7   : > { %1538 = vset.pattern.permute.xlu1 %v1844_v40 }
  0xd8   : > { %770 = vperm.xlu1 %1538, %v2164_v2  }
 0x137   : > { %v550_v12 = vpop.permute.xlu1 %549  ;;  %v540_v13 = vpop.permute.xlu0 %539 }
 0x138   : > { %v543_v14 = vmul.f32 %v540_v13, %v531_v11  ;;  %v517_v13 = vld [vmem:[#allocation11 + $0x8] sm:$0xff] }
 0x13a   : > { %v553_v16 = vadd.f32 %v550_v12, %v543_v14 }
 0x13b   : > { %v546_v17 = vpop.permute.xlu1 %545  ;;  %v535_v18 = vpop.permute.xlu0 %534 }
 0x13c   : > { %v542_v19 = vmul.f32 %v535_v18, %v530_v15  ;;  %v555_v20 = vmax.f32 %v553_v16, 0.0  ;;  %v520_v15 = vld [vmem:[#allocation13] sm:$0xff]  ;;  %v524_v18 = vld [vmem:[%s2298_s9 + $0x10] sm:$0xff] }
 0x13d   : > { %1414 = vmatprep.subr.mxu1 %v524_v18 }
 0x13e   : > { %v552_v21 = vadd.f32 %v546_v17, %v542_v19  ;;  %1371 = vmatprep.subr.mxu0 %v555_v20  ;;  %v521_v17 = vld [vmem:[#allocation13 + $0x8] sm:$0xff]  ;;  %1415 = vmatpush3.msra.mxu1 %v524_v18 }
 0x13f   : > { %1372 = vmatpush3.msra.mxu0 %v555_v20  ;;  %v523_v19 = vld [vmem:[%s2298_s9 + $0x8] sm:$0xff]  ;;  %v522_v20 = vld [vmem:[%s2298_s9] sm:$0xff] }
 0x140   : > { %v554_v23 = vmax.f32 %v552_v21, 0.0  ;;  %v652_v24 = vpop.permute.xlu1 %651  ;;  %v656_v25 = vpop.permute.xlu0 %655  ;;  %1416 = vmatprep.subr.mxu1 %v523_v19 }
 0x141   : > { %v659_v28 = vmul.f32 %v656_v25, %v649_v22  ;;  %v658_v30 = vmul.f32 %v652_v24, %v648_v26  ;;  %1417 = vmatpush3.msra.mxu1 %v523_v19 }
 0x142   : > { %1373 = vmatprep.subr.mxu0 %v554_v23  ;;  %1418 = vmatprep.subr.mxu1 %v522_v20 }
 0x143   : > { %1374 = vmatpush3.msra.mxu0 %v554_v23  ;;  %1419 = vmatpush3.msra.mxu1 %v522_v20 }
 0x144   : > { %1376 = vmatmul.mubr.msk.f32.vlgmr.msra.gmra.mxu0 %vm556_vm0, %v513_v27 }
 0x145   : > { %v666_v31 = vpop.permute.xlu1 %665  ;;  %v662_v32 = vpop.permute.xlu0 %661  ;;  %1382 = vmatprep.mubr.msk.f32.mxu0 %vm556_vm0, %v514_v29 }
 0x146   : > { %v669_v33 = vadd.f32 %v666_v31, %v659_v28  ;;  %v668_v34 = vadd.f32 %v662_v32, %v658_v30 }
 0x148   : > { %v671_v35 = vmax.f32 %v669_v33, 0.0  ;;  %v670_v36 = vmax.f32 %v668_v34, 0.0 }
 0x14a   : > { %1378 = vmatprep.subr.mxu0 %v671_v35  ;;  %v871_v1 = vpop.permute.xlu1 %870  ;;  %v767_v23 = vpop.permute.xlu0 %766 }
 0x14b   : > { %1379 = vmatpush3.msra.mxu0 %v671_v35 }
 0x14c   : > { %1380 = vmatprep.subr.mxu0 %v670_v36 }
 0x14d   : > { %1381 = vmatpush3.msra.mxu0 %v670_v36 }
 0x14e   : > { %1383 = vmatmul.mubr.msk.f32.vlgmr.msra.gmra.mxu0 %vm556_vm0, %v515_v37  ;;  %v867_v6 = vpop.permute.xlu1 %866 }
 0x14f   : > { %1389 = vmatprep.mubr.msk.f32.mxu0 %vm556_vm0, %v516_v38 }
 0x153   : > { %v771_v21 = vpop.permute.xlu1 %770 }
 0x17f   : > { %v1396_v2 = vpop.f32.mrf.mxu1 }
 0x180   : > { %v952_v8 = vadd.f32 %v1396_v2, %v871_v1 }
 0x181   : > { %v946_v5 = vpop.f32.mrf.mxu1 }
 0x182   : > { %v947_v11 = vadd.f32 %v946_v5, %v867_v6  ;;  %v956_v14 = vmax.f32 %v952_v8, 0.0 }
 0x184   : > { %v955_v16 = vmax.f32 %v947_v11, 0.0 }
 0x204   : > { %v1377_v45 = vpop.f32.mrf.mxu0 }
 0x205   : > { %v639_v46 = vsub.f32 0.0, %v1377_v45 }
 0x206   : > { %v629_v47 = vpop.f32.mrf.mxu0 }
 0x207   : > { %v638_v48 = vsub.f32 0.0, %v629_v47  ;;  %v642_v49 = vmul.f32 1.442695, %v639_v46 }
 0x209   : > { %v640_v50 = vmul.f32 1.442695, %v638_v48  ;;  %1540 = vpow2.f32 %v642_v49 }
 0x20b   : > { %1542 = vpow2.f32 %v640_v50 }
 0x20e   : > { %v1384_v51 = vpop.f32.mrf.mxu0 }
 0x20f   : > { %v754_v52 = vsub.f32 0.0, %v1384_v51 }
 0x210   : > { %v744_v53 = vpop.f32.mrf.mxu0 }
 0x211   : > { %v757_v54 = vmul.f32 1.442695, %v754_v52  ;;  %v753_v55 = vsub.f32 0.0, %v744_v53 }
 0x213   : > { %1544 = vpow2.f32 %v757_v54  ;;  %v755_v56 = vmul.f32 1.442695, %v753_v55 }
 0x215   : > { %1546 = vpow2.f32 %v755_v56 }
 0x216   : > { %v1541_v57 = vpop.eup %1540 }
 0x217   : > { %v645_v59 = vadd.f32 1.0, %v1541_v57 }
 0x218   : > { %v1543_v58 = vpop.eup %1542 }
 0x219   : > { %v644_v61 = vadd.f32 1.0, %v1543_v58  ;;  %1548 = vrcp.f32 %v645_v59 }
 0x220   : > { %v1545_v60 = vpop.eup %1544 }
 0x221   : > { %v760_v62 = vadd.f32 1.0, %v1545_v60 }
 0x222   : > { %v1547_v63 = vpop.eup %1546 }
 0x223   : > { %1550 = vrcp.f32 %v760_v62  ;;  %v759_v0 = vadd.f32 1.0, %v1547_v63 }
 0x224   : > { %1552 = vrcp.f32 %v644_v61 }
 0x225   : > { %1554 = vrcp.f32 %v759_v0 }
 0x226   : > { %v2217_v3 = vpop.eup %1548 }
 0x230   : > { %v1551_v4 = vpop.eup %1550 }
 0x231   : > { %v2219_v7 = vpop.eup %1552  ;;  %v764_v9 = vadd.f32 %v1551_v4, %v2217_v3  ;;  %v1121_v37 = vsub.f32 %v1551_v4, %v2217_v3 }
 0x232   : > { %v1555_v10 = vpop.eup %1554 }
 0x233   : > { %1385 = vmatprep.subr.mxu0 %v764_v9  ;;  %v763_v12 = vadd.f32 %v1555_v10, %v2219_v7  ;;  %v1120_v40 = vsub.f32 %v1555_v10, %v2219_v7 }
 0x234   : > { %1386 = vmatpush3.msra.mxu0 %v764_v9 }
 0x235   : > { %1387 = vmatprep.subr.mxu0 %v763_v12 }
 0x236   : > { %1388 = vmatpush3.msra.mxu0 %v763_v12 }
 0x237   : > { %1390 = vmatmul.mubr.msk.f32.vlgmr.msra.gmra.mxu0 %vm556_vm0, %v517_v13  ;;  %1397 = vmatprep.subr.mxu0 %v956_v14 }
 0x238   : > { %1398 = vmatpush3.msra.mxu0 %v956_v14  ;;  %1401 = vmatprep.mubr.msk.f32.mxu0 %vm556_vm0, %v520_v15 }
 0x239   : > { %1399 = vmatprep.subr.mxu0 %v955_v16 }
 0x23a   : > { %1400 = vmatpush3.msra.mxu0 %v955_v16 }
 0x23b   : > { %1402 = vmatmul.mubr.msk.f32.vlgmr.msra.gmra.mxu0 %vm556_vm0, %v521_v17 }
 0x2f7   : > { %v1391_v22 = vpop.f32.mrf.mxu0 }
 0x2f8   : > { %v851_v24 = vadd.f32 %v1391_v22, %v771_v21 }
 0x2f9   : > { %v845_v25 = vpop.f32.mrf.mxu0 }
 0x2fa   : > { %v855_v26 = vsub.f32 0.0, %v851_v24  ;;  %v846_v27 = vadd.f32 %v845_v25, %v767_v23 }
 0x2fb   : > { %v1403_v28 = vpop.f32.mrf.mxu0 }
 0x2fc   : > { %v858_v29 = vmul.f32 1.442695, %v855_v26  ;;  %v854_v30 = vsub.f32 0.0, %v846_v27 }
 0x2fd   : > { %v1029_v31 = vpop.f32.mrf.mxu0 }
 0x2fe   : > { %1556 = vpow2.f32 %v858_v29  ;;  %v856_v32 = vmul.f32 1.442695, %v854_v30  ;;  %1420 = vmatprep.mubr.msk.f32.mxu1 %vm1038_vm2, %v1029_v31 }
 0x2ff   : > { %1421 = vmatmul.mubr.msk.f32.vlgmr.msra.gmra.mxu1 %vm1038_vm2, %v1403_v28 }
 0x300   : > { %1558 = vpow2.f32 %v856_v32 }
 0x30b   : > { %v1557_v33 = vpop.eup %1556 }
 0x30c   : > { %v861_v34 = vadd.f32 1.0, %v1557_v33 }
 0x30d   : > { %v1559_v35 = vpop.eup %1558 }
 0x30e   : > { %1560 = vrcp.f32 %v861_v34  ;;  %v860_v36 = vadd.f32 1.0, %v1559_v35 }
 0x310   : > { %1562 = vrcp.f32 %v860_v36 }
 0x31b   : > { %v1561_v38 = vpop.eup %1560 }
 0x31c   : > { %v1123_v39 = vmul.f32 %v1561_v38, %v1121_v37 }
 0x31d   : > { %v1563_v41 = vpop.eup %1562 }
 0x31e   : > { %v1122_v42 = vmul.f32 %v1563_v41, %v1120_v40  ;;  %v1125_v43 = vadd.f32 %v2217_v3, %v1123_v39 }
 0x320   : > { %v1124_v46 = vadd.f32 %v2219_v7, %v1122_v42 }
 0x3bf   : > { %v1422_v44 = vpop.f32.mrf.mxu1 }
 0x3c0   : > { %v1127_v45 = vadd.f32 %v1422_v44, %v1125_v43 }
 0x3c1   : > { %v1111_v47 = vpop.f32.mrf.mxu1 }
 0x3c2   : > { %1129 = vst [vmem:[%s509_s13 + $0x8] sm:$0xff] %v1127_v45  ;;  %v1126_v48 = vadd.f32 %v1124_v46, %v1111_v47 }
 0x3c4   : > { %1128 = vst [vmem:[%s509_s13] sm:$0xff] %v1126_v48 }
 0x3c5   : > { %1765 = shalt.err (!%p1762_p3)
}
 0x3c6   : > { %s1766_s27 = scalar_lea.hbm %s2246_s20, 256  ;;  %s1770_s21 = scalar_lea.hbm %s2357_s6, 512 }
 0x3c7   : > { %p1767_p7 = scmp.ne.s32.totalorder %s2246_s20, %s1766_s27  ;;  %p1771_p2 = scmp.lt.s32.totalorder %s2246_s20, %s2357_s6 }
 0x3c8   : > { %p1772_p0 = scmp.lt.s32.totalorder %s1770_s21, %s1766_s27 }
 0x3c9   : > { %p1768_p13 = pnand %p1767_p7, %p2358_p5 }
 0x3ca   : > { %p1773_p1 = por %p1772_p0, %p1771_p2 }
 0x3cb   : > { %p1769_p9 = pneg %p1768_p13 }
 0x3cd   : > { %p1774_p12 = pnand %p1773_p1, %p1769_p9 }
 0x3cf   : > { %1777 = shalt.err (!%p1774_p12)
}
 0x3d0   : > { %s1846_s15 = smov 128   ;;  %s1847_s29 = smov 8  }
 0x3d1   : > { %1445 = dma.vmem_to_hbm [thread:$0]  (%p2358_p5), %s2240_s18, 256, %s2246_s20, %s1131_s8, %s1846_s15, %s1846_s15, %s1847_s29  }
 0x3d2 PF: > { %s2359_s19 = sld [smem:[#allocation20_spill]]  ;;  %p2362_p8 = scmp.ge.s32.totalorder %s1828_s16, 2 }
 0x3d3   : > { %s2360_s1 = sld [smem:[#allocation22_spill]] }
 0x3d8   : > { %s1159_s25 = sand.u32 1, %s2359_s19  }
 0x3d9   : > { %p2361_p4 = scmp.ne.s32.totalorder %s2360_s1, 0  ;;  %s1160_s13 = scalar_lea.sflag [#allocation4], %s1159_s25 }
 0x3db   : > { %p1471_p11 = pnand %p2362_p8, %p2361_p4 }
 0x3dd   : > { %p1472_p6 = pneg %p1471_p11 }
 0x3df   : > { %1811 = dma.done.wait (%p1472_p6), %s1160_s13, 256  }
 0x3e0   : > { %1813 = vsyncadd (%p1472_p6), %s1160_s13, 4294967040  ;;  %s2363_s16 = sld [smem:[#allocation23_spill]]  ;;  %s2366_s13 = smov %s1820_s14 }
 0x3e1   : > { %s2364_s4 = sld [smem:[#allocation21_spill]] }
 0x3e2   : > { %s2365_s15 = sld [smem:[#allocation24_spill]] }
 0x3e6   : > { %p28_p10 = scmp.ge.s32.totalorder %s2363_s16, 4  }
 0x3e7   : > { %s2367_s14 = smov %s2364_s4 }
 0x3e8   :  { %30 = sbr.rel (!%p28_p10) target bundleno = 17 (0x11), region = 145 }
 0x3ed   :  { %1165 = vsyncpa [#allocation3], 1 }
 0x3ee   :  { %1167 = vsyncpa [#allocation3 + $0x1], 1 }
 0x3ef   :  { %1168 = vsyncpa [#allocation6], 1 }
 0x3f0   :  { %1170 = vsyncpa [#allocation6 + $0x1], 1 }
 0x3f1   :  { %1171 = vsyncpa [#allocation9], 1 }
 0x3f2   :  { %1172 = vsyncpa [#allocation12], 1 }
 0x3f3   :  { %1173 = vsyncpa [#allocation4], 1 }
 0x3f4   :  { %1175 = vsyncpa [#allocation4 + $0x1], 1 }

</bundles_post_ra>
